<compile_context>
chip_gen: v5e
topology: v5e:2x2
jax: 0.10.0
libtpu: 0.0.40
codegen_flags: <defaults>
</compile_context>

<pallas_src>
import functools
import math

import numpy as np

import jax
import jax.numpy as jnp
from jax import lax
from jax.experimental import pallas as pl
from jax.experimental.pallas import tpu as pltpu

_LANE = 128
_MIN_GRID_STEPS = 8          # keep >= 8 parallel steps (megacore + pipelining)


def _cdiv(a, b):
    return -(-a // b)


def _round_up(a, b):
    return _cdiv(a, b) * b


def _sublane_multiple(dtype):
    # Packed sublane tile: 32 rows for int8, 16 for 16-bit, 8 for 32-bit.
    return max(8, 32 // jnp.dtype(dtype).itemsize)


def _tpu_memory_policy():
    """(per-buffer output tile target bytes, vmem_limit_bytes), generation aware."""
    try:
        vmem_cap = int(pltpu.get_tpu_info().vmem_capacity_bytes)
    except Exception:  # query unavailable -> conservative (v7x-safe) defaults
        vmem_cap = 64 * 1024 * 1024
    if vmem_cap >= 128 * 1024 * 1024:       # v5e / v6e: 128 MiB physical VMEM
        return 16 * 1024 * 1024, 96 * 1024 * 1024
    # v7x: 64 MiB physical; leave headroom for double buffers + constants.
    return 8 * 1024 * 1024, 44 * 1024 * 1024


def _pick_rows(rows, row_bytes, tile_target, sub, min_steps):
    """Largest sublane-aligned row block s.t. the block fits `tile_target` and
    the grid keeps >= `min_steps` steps whenever there is enough work."""
    bm = max(sub, (tile_target // max(row_bytes, 1)) // sub * sub)
    per_step = _round_up(_cdiv(rows, min_steps), sub)
    bm = min(bm, max(sub, per_step))
    if bm >= rows:
        return rows                      # single full-extent block (always legal)
    return bm


# ----------------------------------------------------------------------------
# Small-C path: flat lane-dense output (rows, G*C) with G*C = lcm(C, 128).
# Flat column f = n*C + c maps to logical out[row*G + n, c].
# x_rep[r, f] = x[r, f // C] is produced by one MXU matmul with the constant
# expansion matrix E[n, f] = (f // C == n); a single VPU compare against the
# constant class row (f % C) yields the one-hot bits, stored fully lane-dense.
# The bf16 matmul is exact because C < 128 => all matchable ids <= 127.
# ----------------------------------------------------------------------------
def _one_hot_narrow_kernel(x_ref, e_ref, cls_ref, o_ref):
    x = x_ref[...].astype(e_ref.dtype)                      # (bm, G)
    x_rep = jnp.dot(x, e_ref[...],
                    preferred_element_type=jnp.float32)     # (bm, lc)
    o_ref[...] = (jnp.abs(x_rep - cls_ref[...]) < 0.5).astype(o_ref.dtype)


def _one_hot_narrow(x_flat, num_classes, dtype, tile_target, vmem_limit):
    m = x_flat.shape[0]
    g = _LANE // math.gcd(num_classes, _LANE)      # minimal row grouping
    lc = g * num_classes                           # = lcm(num_classes, 128)

    rows = _cdiv(m, g)
    pad = rows * g - m
    if pad:
        # Pad with an out-of-range id -> all-zero rows. NOTE: the final
        # out[:m] slice below materializes a copy; with the minimal grouping G
        # this only triggers when m % G != 0 (rare for actor-style shapes).
        x_flat = jnp.pad(x_flat, (0, pad), constant_values=num_classes)
    x2 = x_flat.reshape(rows, g)

    # Compile-time constants (NumPy -> folded into the executable).
    f = np.arange(lc, dtype=np.int32)
    n = np.arange(g, dtype=np.int32)
    expand = (f[None, :] // num_classes == n[:, None]).astype(jnp.bfloat16)  # (g, lc)
    cls_row = (f % num_classes).astype(np.float32).reshape(1, lc)            # (1, lc)

    itemsize = jnp.dtype(dtype).itemsize
    sub = _sublane_multiple(dtype)
    bm = _pick_rows(rows, lc * itemsize, tile_target, sub, _MIN_GRID_STEPS)
    grid = (_cdiv(rows, bm),)

    cost = pl.CostEstimate(
        flops=2 * rows * g * lc,
        transcendentals=0,
        bytes_accessed=rows * lc * itemsize + rows * g * 4
        + expand.size * 2 + cls_row.size * 4,
    )

    out_flat = pl.pallas_call(
        _one_hot_narrow_kernel,
        out_shape=jax.ShapeDtypeStruct((rows, lc), dtype),
        grid_spec=pltpu.PrefetchScalarGridSpec(
            num_scalar_prefetch=0,
            grid=grid,
            in_specs=[
                pl.BlockSpec((bm, g), lambda i: (i, 0)),
                # Constant index_map: fetched once, never re-DMA'd across steps.
                pl.BlockSpec((g, lc), lambda i: (0, 0)),
                pl.BlockSpec((1, lc), lambda i: (0, 0)),
            ],
            out_specs=pl.BlockSpec((bm, lc), lambda i: (i, 0)),
        ),
        compiler_params=pltpu.CompilerParams(
            dimension_semantics=("parallel",),
            vmem_limit_bytes=vmem_limit,
        ),
        cost_estimate=cost,
    )(x2, expand, cls_row)

    out = out_flat.reshape(rows * g, num_classes)   # free row-major bitcast
    if pad:
        out = out[:m]                               # copies only when padded
    return out


# ----------------------------------------------------------------------------
# Large-C path: (M, C) layout, class axis on lanes, tiled by a second
# "parallel" grid axis (vocab-style one-hot).
# ----------------------------------------------------------------------------
def _one_hot_wide_kernel(x_ref, o_ref):
    bc = o_ref.shape[-1]
    cls = pl.program_id(1) * bc + lax.broadcasted_iota(jnp.int32, (1, bc), 1)
    o_ref[...] = (x_ref[...] == cls).astype(o_ref.dtype)


def _one_hot_wide(x_flat, num_classes, dtype, tile_target, vmem_limit):
    m = x_flat.shape[0]
    x2 = x_flat.reshape(m, 1)

    itemsize = jnp.dtype(dtype).itemsize
    sub = _sublane_multiple(dtype)

    # Class block: full extent when moderate; otherwise a 128-aligned 2048-wide
    # block (>= 2 KiB contiguous per output row even for int8). Beyond that the
    # tile budget goes to more rows (bm), not wider class blocks.
    bc = num_classes if num_classes <= 2048 else 2048
    grid_c = _cdiv(num_classes, bc)

    min_m_steps = max(1, _cdiv(_MIN_GRID_STEPS, grid_c))
    bm = _pick_rows(m, bc * itemsize, tile_target, sub, min_m_steps)
    grid = (_cdiv(m, bm), grid_c)

    cost = pl.CostEstimate(
        flops=0,
        transcendentals=0,
        bytes_accessed=m * num_classes * itemsize + m * 4,
    )

    return pl.pallas_call(
        _one_hot_wide_kernel,
        out_shape=jax.ShapeDtypeStruct((m, num_classes), dtype),
        grid_spec=pltpu.PrefetchScalarGridSpec(
            num_scalar_prefetch=0,
            grid=grid,
            in_specs=[pl.BlockSpec((bm, 1), lambda i, j: (i, 0))],
            out_specs=pl.BlockSpec((bm, bc), lambda i, j: (i, j)),
        ),
        compiler_params=pltpu.CompilerParams(
            dimension_semantics=("parallel", "parallel"),
            vmem_limit_bytes=vmem_limit,
        ),
        cost_estimate=cost,
    )(x2)


@functools.partial(jax.jit, static_argnames=("num_classes", "dtype"))
def one_hot_pallas(x, *, num_classes, dtype=jnp.int8):
    """Pallas TPU one-hot: returns x.shape + (num_classes,) with 0/1 values.

    Out-of-range / negative indices produce all-zero rows (PyTorch raises).
    Output dtype defaults to int8 (same 0/1 values as torch's int64, ~4-8x less
    HBM write traffic for this writeback-bound op); pass jnp.int32 if needed.
    """
    num_classes = int(num_classes)
    orig_shape = x.shape
    x_flat = x.astype(jnp.int32).reshape(-1)
    tile_target, vmem_limit = _tpu_memory_policy()
    if num_classes >= _LANE:
        out2d = _one_hot_wide(x_flat, num_classes, dtype, tile_target, vmem_limit)
    else:
        out2d = _one_hot_narrow(x_flat, num_classes, dtype, tile_target, vmem_limit)
    return out2d.reshape(orig_shape + (num_classes,))


class OneHotLayer:
    """JAX/Pallas port of the PyTorch OneHotLayer (torch.nn.functional.one_hot).

    torch returns int64 {0,1}; this port defaults to int8 (identical values).
    """

    def __call__(self, x, num_classes=None, dtype=jnp.int8):
        if num_classes is None:
            # torch default: num_classes = x.max() + 1, inferred from concrete
            # data. That requires a device->host sync and one compilation per
            # distinct value; pass num_classes explicitly on hot paths.
            num_classes = int(jax.device_get(jnp.max(x))) + 1
        return one_hot_pallas(x, num_classes=int(num_classes), dtype=dtype)


if __name__ == "__main__":
    key = jax.random.PRNGKey(0)
    k1, k2, k3 = jax.random.split(key, 3)
    layer = OneHotLayer()

    # Small-C path (lane-dense flat layout via MXU expansion): actor-style grid.
    R, N, C = 16, 128, 16
    x_small = jax.random.randint(k1, (R, N), 0, C, dtype=jnp.int32)
    out_small = jax.block_until_ready(layer(x_small, num_classes=C))
    ref_small = jax.nn.one_hot(x_small, C, dtype=out_small.dtype)
    assert out_small.shape == (R, N, C), out_small.shape
    assert bool(jnp.all(out_small == ref_small)), "narrow-path mismatch"

    # Small odd C with a ragged tail (exercises minimal grouping + tail slice),
    # int32 output.
    C2 = 7
    x_odd = jax.random.randint(k2, (3, 50), 0, C2, dtype=jnp.int32)
    out_odd = jax.block_until_ready(layer(x_odd, num_classes=C2, dtype=jnp.int32))
    assert out_odd.shape == (3, 50, C2), out_odd.shape
    assert bool(jnp.all(out_odd == jax.nn.one_hot(x_odd, C2, dtype=jnp.int32))), \
        "narrow-path (ragged) mismatch"

    # Large-C path (class-axis grid, classes on lanes): small vocab-style check.
    CW = 256
    x_wide = jax.random.randint(k3, (4, 96), 0, CW, dtype=jnp.int32)
    out_wide = jax.block_until_ready(layer(x_wide, num_classes=CW))
    ref_wide = jax.nn.one_hot(x_wide, CW, dtype=out_wide.dtype)
    assert out_wide.shape == (4, 96, CW), out_wide.shape
    assert bool(jnp.all(out_wide == ref_wide)), "wide-path mismatch"

    # Inferred num_classes (exact torch.nn.functional.one_hot(x) semantics,
    # with the documented host sync).
    out_inferred = jax.block_until_ready(layer(x_small))
    C_inf = int(jax.device_get(jnp.max(x_small))) + 1
    assert out_inferred.shape == (R, N, C_inf), out_inferred.shape
    assert bool(jnp.all(out_inferred ==
                        jax.nn.one_hot(x_small, C_inf, dtype=out_inferred.dtype)))

    print("KERNEL_OK")
</pallas_src>

<mosaic_0001>
module attributes {stable_mosaic.version = 11 : i64} {
  func.func @_one_hot_narrow_kernel(%arg0: i32, %arg1: memref<32x8xi32, #tpu.memory_space<vmem>>, %arg2: memref<8x128xbf16, #tpu.memory_space<vmem>>, %arg3: memref<1x128xf32, #tpu.memory_space<vmem>>, %arg4: memref<32x128xi8, #tpu.memory_space<vmem>>) attributes {dimension_semantics = [#tpu.dimension_semantics<parallel>], iteration_bounds = array<i64: 8>, scalar_prefetch = 0 : i64, scratch_operands = 0 : i64, tpu.core_type = #tpu.core_type<tc>, window_params = [{transform_indices = @transform_0, window_bounds = array<i64: 32, 8>}, {pipeline_mode = #tpu.pipeline_mode<synchronous>, transform_indices = @transform_1, window_bounds = array<i64: 8, 128>}, {pipeline_mode = #tpu.pipeline_mode<synchronous>, transform_indices = @transform_2, window_bounds = array<i64: 1, 128>}, {transform_indices = @transform_3, window_bounds = array<i64: 32, 128>}]} {
    %c0 = arith.constant 0 : index
    %c0_0 = arith.constant 0 : index
    %0 = vector.load %arg1[%c0, %c0_0] : memref<32x8xi32, #tpu.memory_space<vmem>>, vector<32x8xi32>
    %1 = arith.sitofp %0 : vector<32x8xi32> to vector<32x8xbf16>
    %c0_1 = arith.constant 0 : index
    %c0_2 = arith.constant 0 : index
    %2 = vector.load %arg2[%c0_1, %c0_2] : memref<8x128xbf16, #tpu.memory_space<vmem>>, vector<8x128xbf16>
    %cst = arith.constant dense<0.000000e+00> : vector<32x128xf32>
    %3 = tpu.matmul %1, %2, %cst {dimension_numbers = #tpu.dot_dimension_numbers<[1], [0], [0], [1], [0, 0, 1, 1], [], []>} : vector<32x8xbf16>, vector<8x128xbf16>, vector<32x128xf32> -> vector<32x128xf32>
    %c0_3 = arith.constant 0 : index
    %c0_4 = arith.constant 0 : index
    %4 = vector.load %arg3[%c0_3, %c0_4] : memref<1x128xf32, #tpu.memory_space<vmem>>, vector<1x128xf32>
    %5 = vector.broadcast %4 : vector<1x128xf32> to vector<32x128xf32>
    %6 = arith.subf %3, %5 : vector<32x128xf32>
    %7 = math.absf %6 : vector<32x128xf32>
    %cst_5 = arith.constant 5.000000e-01 : f32
    %8 = vector.broadcast %cst_5 : f32 to vector<32x128xf32>
    %9 = arith.cmpf olt, %7, %8 : vector<32x128xf32>
    %10 = arith.extui %9 : vector<32x128xi1> to vector<32x128xi8>
    %c0_6 = arith.constant 0 : index
    %c0_7 = arith.constant 0 : index
    %11 = vector.load %arg4[%c0_6, %c0_7] : memref<32x128xi8, #tpu.memory_space<vmem>>, vector<32x128xi8>
    tpu.vector_store %arg4[%c0_6, %c0_7], %10 {strides = array<i32>} : memref<32x128xi8, #tpu.memory_space<vmem>>, vector<32x128xi8>,
    return
  }
  func.func @transform_0(%arg0: i32) -> (i32, i32) {
    %c0_i32 = arith.constant 0 : i32
    %c0_i32_0 = arith.constant 0 : i32
    return %arg0, %c0_i32 : i32, i32
  }
  func.func @transform_1(%arg0: i32) -> (i32, i32) {
    %c0_i32 = arith.constant 0 : i32
    %c0_i32_0 = arith.constant 0 : i32
    %c0_i32_1 = arith.constant 0 : i32
    return %c0_i32, %c0_i32_0 : i32, i32
  }
  func.func @transform_2(%arg0: i32) -> (i32, i32) {
    %c0_i32 = arith.constant 0 : i32
    %c0_i32_0 = arith.constant 0 : i32
    %c0_i32_1 = arith.constant 0 : i32
    return %c0_i32, %c0_i32_0 : i32, i32
  }
  func.func @transform_3(%arg0: i32) -> (i32, i32) {
    %c0_i32 = arith.constant 0 : i32
    %c0_i32_0 = arith.constant 0 : i32
    return %arg0, %c0_i32 : i32, i32
  }
}

</mosaic_0001>

<bundles_post_ra>
// kernel: one_hot_pallas.1
= control target key start
LH: loop header
LB: loop body
LE: loop exit
PB: predicated region body
PF: predicated region fallthrough
CT: control target
= control target key end

     0   :  { %s366_s12 = smov 0   ;;  %s393_s0 = inlined_call_operand.vmem [shape: s32[256,8], index: 0, kind: input, shape index: {}]   ;;  %s394_s1 = inlined_call_operand.vmem [shape: bf16[8,128], index: 1, kind: input, shape index: {}]   ;;  %s395_s2 = inlined_call_operand.vmem [shape: f32[1,128], index: 2, kind: input, shape index: {}]   ;;  %s396_s3 = inlined_call_operand.vmem [shape: s8[256,128], index: 3, kind: output, shape index: {}]  }
   0x1 LB: > { %s313_s13 = sadd.s32 4294967295, %s343_s12   ;;  %p317_p0 = scmp.ge.s32.totalorder %s343_s12, 1  ;;  %s343_s12 = sphi %s366_s12, %s13_s12  }
   0x2   : > { %p138_p1 = scmp.lt.s32.totalorder %s343_s12, 9 }
   0x4   : > { %p139_p2 = pnand %p317_p0, %p138_p1 }
   0x5   : > { %s318_s16 = sshll.u32 (!%p139_p2), %s313_s13, 2 }
   0x6   : > { %142 = sbr.rel (%p139_p2) target bundleno = 175 (0xaf), region = 32  ;;  %p163_p3 = scmp.lt.s32.totalorder (!%p139_p2), %s318_s16, 31 }
   0xb   : > { %v187_v0 = vld [vmem:[%s394_s1] sm:$0xf]  ;;  %vm195_vm0 = vcmask 1043456   ;;  %s398_s16 = smov (!%p163_p3, %s318_s16), 31  ;;  %vm188_vm1 = vcmask 64512   ;;  %v345_v25 = vmov 0  }
   0xc   : > { %v197_v1 = vsel %vm195_vm0, %v187_v0, 0  ;;  %s319_s17 = sshll.u32 %s398_s16, 3  ;;  %v336_v13 = vld [vmem:[%s395_s2] ss:$0 sm:$0xff]  ;;  %s321_s23 = sshll.u32 %s398_s16, 1 }
   0xd   : > { %206 = vmatpush.bf16.msra.mxu0 %v197_v1  ;;  %326 = vmatpush.bf16.msra.mxu1 %v197_v1  ;;  %s166_s20 = scalar_lea.vmem %s393_s0, %s319_s17  ;;  %s172_s26 = scalar_lea.vmem %s396_s3, %s321_s23 }
   0xe   : > { %v177_v2 = vld [vmem:[%s166_s20] sm:$0xff]  ;;  %v178_v3 = vld [vmem:[%s166_s20 + $0x8] sm:$0xff]  ;;  %v179_v4 = vld [vmem:[%s166_s20 + $0x10] sm:$0xff] }
   0xf   : > { %v181_v5 = vcvt.s32.f32 %v177_v2  ;;  %v182_v6 = vcvt.s32.f32 %v178_v3  ;;  %v180_v7 = vld [vmem:[%s166_s20 + $0x18] sm:$0xff]  ;;  %v183_v8 = vcvt.s32.f32 %v179_v4 }
  0x10   : > { %v184_v9 = vcvt.s32.f32 %v180_v7 }
  0x11   : > { %v185_v10 = vpack.c.bf16 %v182_v6, %v181_v5 }
  0x12   : > { %v186_v11 = vpack.c.bf16 %v184_v9, %v183_v8 }
  0x13   : > { %322 = vmatmul.msk.bf16.vlgmr.msra.gmra.mxu0 %vm188_vm1, %v185_v10 }
  0x14   : > { %323 = vmatmul.msk.bf16.vlgmr.msra.gmra.mxu1 %vm188_vm1, %v186_v11 }
  0x90   : > { %v208_v12 = vpop.f32.mrf.mxu0 }
  0x91   : > { %v213_v14 = vpop.f32.mrf.mxu1  ;;  %v222_v15 = vsub.f32 %v208_v12, %v336_v13 }
  0x92   : > { %v224_v16 = vsub.f32 %v213_v14, %v336_v13 }
  0x93   : > { %v226_v18 = vand.u32 2147483647, %v222_v15 }
  0x94   : > { %v228_v21 = vand.u32 2147483647, %v224_v16 }
  0x95   : > { %vm230_vm2 = vcmp.lt.f32.partialorder %v226_v18, 0.5 }
  0x96   : > { %vm232_vm4 = vcmp.lt.f32.partialorder %v228_v21, 0.5 }
  0x98   : > { %v210_v17 = vpop.f32.mrf.mxu0 }
  0x99   : > { %v223_v19 = vsub.f32 %v210_v17, %v336_v13  ;;  %v215_v20 = vpop.f32.mrf.mxu1 }
  0x9a   : > { %v225_v22 = vsub.f32 %v215_v20, %v336_v13 }
  0x9b   : > { %v227_v23 = vand.u32 2147483647, %v223_v19 }
  0x9c   : > { %v229_v24 = vand.u32 2147483647, %v225_v22 }
  0x9d   : > { %vm231_vm3 = vcmp.lt.f32.partialorder %v227_v23, 0.5 }
  0x9e   : > { %vm234_vm5 = vmpackc.low %vm231_vm3, %vm230_vm2  ;;  %vm233_vm6 = vcmp.lt.f32.partialorder %v229_v24, 0.5 }
  0x9f   : > { %v236_v26 = vsel %vm234_vm5, 16711935, %v345_v25  ;;  %vm235_vm7 = vmpackc.low %vm233_vm6, %vm232_vm4 }
  0xa0   : > { %v237_v27 = vsel %vm235_vm7, 16711935, %v345_v25 }
  0xa1   : > { %v238_v28 = vpack.c.b8 %v237_v27, %v236_v26 }
  0xa3   : > { %vm239_vm8 = vnez %v238_v28 }
  0xa4   : > { %v240_v29 = vsel %vm239_vm8, 16843009, %v345_v25 }
  0xa5   : > { %v241_v30 = vunpack.c.0.s8 %v240_v29  ;;  %v242_v31 = vunpack.c.1.s8 %v240_v29  ;;  %v243_v32 = vunpack.c.2.s8 %v240_v29  ;;  %v244_v33 = vunpack.c.3.s8 %v240_v29 }
  0xa7   : > { %v245_v34 = vpack.c.b16 %v241_v30, %v241_v30  ;;  %v247_v35 = vpack.c.b16 %v242_v31, %v242_v31  ;;  %v249_v36 = vpack.c.b16 %v243_v32, %v243_v32  ;;  %v251_v37 = vpack.c.b16 %v244_v33, %v244_v33 }
  0xa9   : > { %v246_v38 = vpack.c.b8 %v245_v34, %v245_v34  ;;  %v248_v39 = vpack.c.b8 %v247_v35, %v247_v35  ;;  %v250_v40 = vpack.c.b8 %v249_v36, %v249_v36  ;;  %v252_v41 = vpack.c.b8 %v251_v37, %v251_v37 }
  0xab   : > { %253 = vst [vmem:[%s172_s26] sm:$0x3] %v246_v38 }
  0xac   : > { %254 = vst [vmem:[%s172_s26 + $0x2] sm:$0x3] %v248_v39 }
  0xad   : > { %255 = vst [vmem:[%s172_s26 + $0x4] sm:$0x3] %v250_v40 }
  0xae   : > { %256 = vst [vmem:[%s172_s26 + $0x6] sm:$0x3] %v252_v41 }
  0xaf PF: > { %s13_s12 = sadd.s32 1, %s343_s12  }
  0xb0   : > { %p10_p4 = scmp.ge.s32.totalorder %s13_s12, 10  }
  0xb2   :  { %12 = sbr.rel (!%p10_p4) target bundleno = 1 (0x1), region = 62 }

</bundles_post_ra>
